<compile_context>
chip_gen: v6e
topology: v6e:2x2x1
jax: 0.10.0
libtpu: 0.0.40
codegen_flags: <defaults>
</compile_context>

<pallas_src>
import functools

import jax
import jax.numpy as jnp
from jax.experimental import pallas as pl
from jax.experimental.pallas import tpu as pltpu


def _round_up(x: int, m: int) -> int:
    return ((x + m - 1) // m) * m


def _critic_kernel(*refs, hidden):
    """One batch tile of q = w_f . act(... W2 @ act(W1 @ xa + b1) + b2 ...) + b_f.

    Feature-major layout (features on sublanes, batch on lanes):
      refs[0]        xa_ref   : (D,  TB)        streamed tile of concat(X, A)^T
      refs[1:1+L]    w_refs   : (H_i, H_{i-1})  resident hidden-layer weights
      refs[1+L]      tail_ref : (Hmax, L+2)     resident [b_1..b_L, w_f, b_f@row0]
      refs[2+L]      out_ref  : (1,  TB)        lane-dense critic values
    """
    L = len(hidden)
    xa_ref = refs[0]
    w_refs = refs[1:1 + L]
    tail_ref = refs[1 + L]
    out_ref = refs[2 + L]

    tail = tail_ref[...]
    h = xa_ref[...]
    for i in range(L):
        b_i = tail[:hidden[i], i:i + 1]                 # (H_i, 1) broadcasts over lanes
        h = jnp.dot(w_refs[i][...], h, preferred_element_type=jnp.float32)
        h = jnp.maximum(h + b_i, 0.0)                   # ReLU (hidden_act default)

    w_f = tail[:hidden[-1], L:L + 1]                    # (H_last, 1)
    b_f = tail[0:1, L + 1:L + 2]                        # (1, 1)
    # fc_final_layer: 1 output feature -> VPU multiply + sublane (XLU) reduce,
    # result stays lane-dense.
    out_ref[...] = jnp.sum(h * w_f, axis=0, keepdims=True) + b_f


def critic_forward(X, A, params, *, tb: int = 1024):
    """Pallas forward for CriticNetwork.  Returns torch.squeeze()-ed Q values."""
    ws = [w for (w, _) in params]       # torch layout: W is (out, in)
    bs = [b for (_, b) in params]
    *hidden_ws, w_f = ws
    *hidden_bs, b_f = bs
    hidden = tuple(int(w.shape[0]) for w in hidden_ws)
    L = len(hidden)
    Hmax = max(hidden)

    B = X.shape[0]
    D = X.shape[-1] + A.shape[-1]
    assert hidden_ws[0].shape[1] == D
    for i in range(1, L):
        assert hidden_ws[i].shape[1] == hidden[i - 1]
    assert w_f.shape == (1, hidden[-1])

    # Batch tile: multiple of 128 lanes, capped at `tb`.  Per-step VMEM stays
    # comfortably inside every generation's scoped-VMEM budget.
    TB = min(_round_up(tb, 128), _round_up(B, 128))
    Bp = _round_up(B, TB)
    grid = (Bp // TB,)

    # Glue (matches torch.concatenate in forward): concat, zero-pad the batch
    # to a tile multiple, transpose to feature-major so batch lies on lanes.
    xa = jnp.concatenate([X.astype(jnp.float32), A.astype(jnp.float32)], axis=-1)
    xa_t = jnp.pad(xa, ((0, Bp - B), (0, 0))).T                       # (D, Bp)

    # Pack the small tail parameters into ONE VMEM tile (one resident DMA).
    tail = jnp.zeros((Hmax, L + 2), jnp.float32)
    for i, b in enumerate(hidden_bs):
        tail = tail.at[:hidden[i], i].set(b.astype(jnp.float32))
    tail = tail.at[:hidden[-1], L].set(w_f.astype(jnp.float32).reshape(-1))
    tail = tail.at[0, L + 1].set(b_f.astype(jnp.float32).reshape(()))

    in_specs = [pl.BlockSpec((D, TB), lambda i: (0, i))]              # streamed activations
    prev = D
    for hdim in hidden:
        in_specs.append(pl.BlockSpec((hdim, prev), lambda i: (0, 0)))  # resident weights
        prev = hdim
    in_specs.append(pl.BlockSpec((Hmax, L + 2), lambda i: (0, 0)))    # packed biases/w_f/b_f

    # Advisory cost hint for XLA's scheduler.
    dims = (D,) + hidden + (1,)
    flops = 2 * Bp * sum(dims[i] * dims[i + 1] for i in range(len(dims) - 1))
    bytes_accessed = 4 * (D * Bp + Bp + sum(int(w.size) for w in hidden_ws)
                          + Hmax * (L + 2))
    cost = pl.CostEstimate(flops=flops, transcendentals=0,
                           bytes_accessed=bytes_accessed)

    kernel = functools.partial(_critic_kernel, hidden=hidden)
    out = pl.pallas_call(
        kernel,
        grid=grid,
        in_specs=in_specs,
        out_specs=pl.BlockSpec((1, TB), lambda i: (0, i)),            # lane-dense output
        out_shape=jax.ShapeDtypeStruct((1, Bp), jnp.float32),
        compiler_params=pltpu.CompilerParams(
            dimension_semantics=("parallel",)),                       # both TCs on v7x
        cost_estimate=cost,
    )(xa_t, *[w.astype(jnp.float32) for w in hidden_ws], tail)

    q = out[0, :B]                          # drop batch padding -> (B,)
    return jnp.squeeze(q.reshape(B, 1))     # torch.squeeze semantics


def init_critic_params(key, input_dims, n_actions, hidden_layers):
    """Deterministic init mimicking nn.Linear; weights in torch (out, in) layout."""
    params = []
    m1 = input_dims + n_actions
    dims = list(hidden_layers) + [1]
    for m2 in dims:
        key, kw, kb = jax.random.split(key, 3)
        bound = 1.0 / jnp.sqrt(jnp.float32(m1))
        w = jax.random.uniform(kw, (m2, m1), jnp.float32, -bound, bound)
        b = jax.random.uniform(kb, (m2,), jnp.float32, -bound, bound)
        params.append((w, b))
        m1 = m2
    return params


def critic_reference(X, A, params):
    """Pure-JAX reference for correctness check."""
    h = jnp.concatenate([X, A], axis=-1)
    *hidden_params, (w_f, b_f) = params
    for (w, b) in hidden_params:
        h = jnp.maximum(h @ w.T + b, 0.0)
    return jnp.squeeze(h @ w_f.T + b_f)


if __name__ == "__main__":
    key = jax.random.PRNGKey(0)
    kx, ka, kp, kx2, ka2, kp3, kx3, ka3 = jax.random.split(key, 8)

    # small shapes consistent with the module's forward
    batch = 8
    input_dims = 24
    n_actions = 8
    hidden_layers = [64, 32]

    X = jax.random.normal(kx, (batch, input_dims), jnp.float32)
    A = jax.random.normal(ka, (batch, n_actions), jnp.float32)
    params = init_critic_params(kp, input_dims, n_actions, hidden_layers)

    q = jax.block_until_ready(critic_forward(X, A, params))
    q_ref = critic_reference(X, A, params)
    assert q.shape == (batch,), q.shape
    assert jnp.allclose(q, q_ref, atol=1e-4, rtol=1e-4), float(jnp.max(jnp.abs(q - q_ref)))

    # second check: exercises a multi-step batch grid (grid > 1) plus padding.
    B2 = 300
    X2 = jax.random.normal(kx2, (B2, input_dims), jnp.float32)
    A2 = jax.random.normal(ka2, (B2, n_actions), jnp.float32)
    q2 = jax.block_until_ready(critic_forward(X2, A2, params, tb=128))
    q2_ref = critic_reference(X2, A2, params)
    assert q2.shape == (B2,), q2.shape
    assert jnp.allclose(q2, q2_ref, atol=1e-4, rtol=1e-4), float(jnp.max(jnp.abs(q2 - q2_ref)))

    # third check: the module's DEFAULT hidden_layers=[400, 300] (non-8-multiple
    # feature dims, larger resident weights) at a small batch.
    B3 = 16
    params3 = init_critic_params(kp3, input_dims, n_actions, [400, 300])
    X3 = jax.random.normal(kx3, (B3, input_dims), jnp.float32)
    A3 = jax.random.normal(ka3, (B3, n_actions), jnp.float32)
    q3 = jax.block_until_ready(critic_forward(X3, A3, params3))
    q3_ref = critic_reference(X3, A3, params3)
    assert q3.shape == (B3,), q3.shape
    assert jnp.allclose(q3, q3_ref, atol=1e-4, rtol=1e-4), float(jnp.max(jnp.abs(q3 - q3_ref)))

    print("KERNEL_OK")
</pallas_src>

<mosaic_0001>
module attributes {stable_mosaic.version = 11 : i64} {
  func.func @_critic_kernel(%arg0: i32, %arg1: memref<32x128xf32, #tpu.memory_space<vmem>>, %arg2: memref<64x32xf32, #tpu.memory_space<vmem>>, %arg3: memref<32x64xf32, #tpu.memory_space<vmem>>, %arg4: memref<64x4xf32, #tpu.memory_space<vmem>>, %arg5: memref<1x128xf32, #tpu.memory_space<vmem>>) attributes {dimension_semantics = [#tpu.dimension_semantics<parallel>], iteration_bounds = array<i64: 1>, scalar_prefetch = 0 : i64, scratch_operands = 0 : i64, tpu.core_type = #tpu.core_type<tc>, window_params = [{transform_indices = @transform_0, window_bounds = array<i64: 32, 128>}, {pipeline_mode = #tpu.pipeline_mode<synchronous>, transform_indices = @transform_1, window_bounds = array<i64: 64, 32>}, {pipeline_mode = #tpu.pipeline_mode<synchronous>, transform_indices = @transform_2, window_bounds = array<i64: 32, 64>}, {pipeline_mode = #tpu.pipeline_mode<synchronous>, transform_indices = @transform_3, window_bounds = array<i64: 64, 4>}, {transform_indices = @transform_4, window_bounds = array<i64: 1, 128>}]} {
    %c0 = arith.constant 0 : index
    %c0_0 = arith.constant 0 : index
    %0 = vector.load %arg4[%c0, %c0_0] : memref<64x4xf32, #tpu.memory_space<vmem>>, vector<64x4xf32>
    %c0_1 = arith.constant 0 : index
    %c0_2 = arith.constant 0 : index
    %1 = vector.load %arg1[%c0_1, %c0_2] : memref<32x128xf32, #tpu.memory_space<vmem>>, vector<32x128xf32>
    %2 = vector.extract_strided_slice %0 {offsets = [0, 0], sizes = [64, 1], strides = [1, 1]} : vector<64x4xf32> to vector<64x1xf32>
    %c0_3 = arith.constant 0 : index
    %c0_4 = arith.constant 0 : index
    %3 = vector.load %arg2[%c0_3, %c0_4] : memref<64x32xf32, #tpu.memory_space<vmem>>, vector<64x32xf32>
    %cst = arith.constant dense<0.000000e+00> : vector<64x128xf32>
    %4 = tpu.matmul %3, %1, %cst {dimension_numbers = #tpu.dot_dimension_numbers<[1], [0], [0], [1], [0, 0, 1, 1], [], []>} : vector<64x32xf32>, vector<32x128xf32>, vector<64x128xf32> -> vector<64x128xf32>
    %5 = vector.broadcast %2 : vector<64x1xf32> to vector<64x128xf32>
    %6 = arith.addf %4, %5 : vector<64x128xf32>
    %cst_5 = arith.constant 0.000000e+00 : f32
    %7 = vector.broadcast %cst_5 : f32 to vector<64x128xf32>
    %8 = arith.maximumf %6, %7 : vector<64x128xf32>
    %9 = vector.extract_strided_slice %0 {offsets = [0, 1], sizes = [32, 1], strides = [1, 1]} : vector<64x4xf32> to vector<32x1xf32>
    %c0_6 = arith.constant 0 : index
    %c0_7 = arith.constant 0 : index
    %10 = vector.load %arg3[%c0_6, %c0_7] : memref<32x64xf32, #tpu.memory_space<vmem>>, vector<32x64xf32>
    %cst_8 = arith.constant dense<0.000000e+00> : vector<32x128xf32>
    %11 = tpu.matmul %10, %8, %cst_8 {dimension_numbers = #tpu.dot_dimension_numbers<[1], [0], [0], [1], [0, 0, 1, 1], [], []>} : vector<32x64xf32>, vector<64x128xf32>, vector<32x128xf32> -> vector<32x128xf32>
    %12 = vector.broadcast %9 : vector<32x1xf32> to vector<32x128xf32>
    %13 = arith.addf %11, %12 : vector<32x128xf32>
    %cst_9 = arith.constant 0.000000e+00 : f32
    %14 = vector.broadcast %cst_9 : f32 to vector<32x128xf32>
    %15 = arith.maximumf %13, %14 : vector<32x128xf32>
    %16 = vector.extract_strided_slice %0 {offsets = [0, 2], sizes = [32, 1], strides = [1, 1]} : vector<64x4xf32> to vector<32x1xf32>
    %17 = vector.extract_strided_slice %0 {offsets = [0, 3], sizes = [1, 1], strides = [1, 1]} : vector<64x4xf32> to vector<1x1xf32>
    %18 = vector.broadcast %16 : vector<32x1xf32> to vector<32x128xf32>
    %19 = arith.mulf %15, %18 : vector<32x128xf32>
    %cst_10 = arith.constant dense<0.000000e+00> : vector<128xf32>
    %20 = vector.multi_reduction <add>, %19, %cst_10 [0] : vector<32x128xf32> to vector<128xf32>
    %21 = vector.shape_cast %20 : vector<128xf32> to vector<1x128xf32>
    %22 = vector.broadcast %17 : vector<1x1xf32> to vector<1x128xf32>
    %23 = arith.addf %21, %22 : vector<1x128xf32>
    %c0_11 = arith.constant 0 : index
    %c0_12 = arith.constant 0 : index
    %24 = vector.load %arg5[%c0_11, %c0_12] : memref<1x128xf32, #tpu.memory_space<vmem>>, vector<1x128xf32>
    tpu.vector_store %arg5[%c0_11, %c0_12], %23 {strides = array<i32>} : memref<1x128xf32, #tpu.memory_space<vmem>>, vector<1x128xf32>,
    return
  }
  func.func @transform_0(%arg0: i32) -> (i32, i32) {
    %c0_i32 = arith.constant 0 : i32
    %c0_i32_0 = arith.constant 0 : i32
    return %c0_i32, %arg0 : i32, i32
  }
  func.func @transform_1(%arg0: i32) -> (i32, i32) {
    %c0_i32 = arith.constant 0 : i32
    %c0_i32_0 = arith.constant 0 : i32
    %c0_i32_1 = arith.constant 0 : i32
    return %c0_i32, %c0_i32_0 : i32, i32
  }
  func.func @transform_2(%arg0: i32) -> (i32, i32) {
    %c0_i32 = arith.constant 0 : i32
    %c0_i32_0 = arith.constant 0 : i32
    %c0_i32_1 = arith.constant 0 : i32
    return %c0_i32, %c0_i32_0 : i32, i32
  }
  func.func @transform_3(%arg0: i32) -> (i32, i32) {
    %c0_i32 = arith.constant 0 : i32
    %c0_i32_0 = arith.constant 0 : i32
    %c0_i32_1 = arith.constant 0 : i32
    return %c0_i32, %c0_i32_0 : i32, i32
  }
  func.func @transform_4(%arg0: i32) -> (i32, i32) {
    %c0_i32 = arith.constant 0 : i32
    %c0_i32_0 = arith.constant 0 : i32
    return %c0_i32, %arg0 : i32, i32
  }
}

</mosaic_0001>

<bundles_post_ra>
// kernel: tpu_custom_call.1
= control target key start
LH: loop header
LB: loop body
LE: loop exit
PB: predicated region body
PF: predicated region fallthrough
CT: control target
= control target key end

     0   :  { %vm78_vm0 = vcmask 261120   ;;  %v499_v3 = vmov 0   ;;  %s616_s0 = inlined_call_operand.vmem [shape: f32[32,128], index: 0, kind: input, shape index: {}]   ;;  %s617_s1 = inlined_call_operand.vmem [shape: f32[64,32], index: 1, kind: input, shape index: {}]   ;;  %s618_s2 = inlined_call_operand.vmem [shape: f32[32,64], index: 2, kind: input, shape index: {}]   ;;  %s619_s3 = inlined_call_operand.vmem [shape: f32[64,4], index: 3, kind: input, shape index: {}]   ;;  %s620_s4 = inlined_call_operand.hbm [shape: f32[1,128], index: 4, kind: output, shape index: {}]  }
   0x1   :  { %v29_v0 = vld [vmem:[%s616_s0 + $0x18] sm:$0xff]  ;;  %v28_v1 = vld [vmem:[%s616_s0 + $0x10] sm:$0xff]  ;;  %v30_v2 = vld [vmem:[%s617_s1] sm:$0xff]  ;;  %470 = vset.pattern.permute.xlu0 %v499_v3  ;;  %471 = vset.pattern.permute.xlu1 %v499_v3 }
   0x2   :  { %423 = vmatprep.subr.mxu0 %v29_v0  ;;  %v27_v4 = vld [vmem:[%s616_s0 + $0x8] sm:$0xff]  ;;  %431 = vmatprep.mubr.msk.f32.mxu0 %vm78_vm0, %v30_v2  ;;  %v26_v5 = vld [vmem:[%s616_s0] sm:$0xff]  ;;  %v25_v6 = vld [vmem:[%s619_s3 + $0x38] sm:$0xff] }
   0x3   :  { %424 = vmatpush3.msra.mxu0 %v29_v0  ;;  %v23_v7 = vld [vmem:[%s619_s3 + $0x28] sm:$0xff]  ;;  %75 = vperm.xlu0 %470, %v25_v6   ;;  %v24_v9 = vld [vmem:[%s619_s3 + $0x30] sm:$0xff] }
   0x4   :  { %425 = vmatprep.subr.mxu0 %v28_v1  ;;  %v31_v8 = vld [vmem:[%s617_s1 + $0x8] sm:$0xff]  ;;  %65 = vperm.xlu1 %471, %v23_v7  }
   0x5   :  { %426 = vmatpush3.msra.mxu0 %v28_v1 }
   0x6   :  { %427 = vmatprep.subr.mxu0 %v27_v4 }
   0x7   :  { %428 = vmatpush3.msra.mxu0 %v27_v4 }
   0x8   :  { %9 = vsyncpa [#allocation3], 0  ;;  %429 = vmatprep.subr.mxu0 %v26_v5  ;;  %v32_v10 = vld [vmem:[%s617_s1 + $0x10] sm:$0xff]  ;;  %v22_v11 = vld [vmem:[%s619_s3 + $0x20] sm:$0xff]  ;;  %70 = vperm.xlu0 %470, %v24_v9   ;;  %vm236_vm1 = vcmask 523264   ;;  %v500_v22 = vmov 1  }
   0x9   :  { %430 = vmatpush3.msra.mxu0 %v26_v5  ;;  %v33_v12 = vld [vmem:[%s617_s1 + $0x18] sm:$0xff]  ;;  %60 = vperm.xlu1 %471, %v22_v11   ;;  %v34_v14 = vld [vmem:[%s617_s1 + $0x20] sm:$0xff]  ;;  %v20_v15 = vld [vmem:[%s619_s3 + $0x10] sm:$0xff]  ;;  %v501_v23 = vmov 2   ;;  %v502_v24 = vmov 3  }
   0xa   :  { %432 = vmatmul.mubr.msk.f32.vlgmr.msra.gmra.mxu0 %vm78_vm0, %v31_v8  ;;  %v21_v13 = vld [vmem:[%s619_s3 + $0x18] sm:$0xff]  ;;  %v35_v16 = vld [vmem:[%s617_s1 + $0x28] sm:$0xff]  ;;  %v36_v18 = vld [vmem:[%s617_s1 + $0x30] sm:$0xff] }
   0xb   :  { %434 = vmatprep.mubr.msk.f32.mxu0 %vm78_vm0, %v32_v10  ;;  %v19_v17 = vld [vmem:[%s619_s3 + $0x8] sm:$0xff]  ;;  %v18_v19 = vld [vmem:[%s619_s3] sm:$0xff]  ;;  %v37_v20 = vld [vmem:[%s617_s1 + $0x38] sm:$0xff] }
   0xc   :  { %55 = vperm.xlu0 %470, %v21_v13   ;;  %v216_v21 = vld [vmem:[%s618_s2] sm:$0xff]  ;;  %v217_v57 = vld [vmem:[%s618_s2 + $0x8] sm:$0xff]  ;;  %v218_v58 = vld [vmem:[%s618_s2 + $0x10] sm:$0xff] }
   0xd   :  { %50 = vperm.xlu1 %471, %v20_v15   ;;  %459 = vmatprep.mubr.msk.f32.mxu1 %vm236_vm1, %v216_v21  ;;  %v219_v59 = vld [vmem:[%s618_s2 + $0x18] sm:$0xff]  ;;  %s503_s2 = smov [#allocation2]  }
   0xe   :  { %435 = vmatmul.mubr.msk.f32.gmra.mxu0 %vm78_vm0, %v33_v12  ;;  %s379_s7 = sshll.u32 %s503_s2, 4  ;;  %s380_s7 = int_to_ptr.vmem [resolvable:$true] %s379_s7 }
   0xf   :  { %437 = vmatprep.mubr.msk.f32.mxu0 %vm78_vm0, %v34_v14  ;;  %s477_s8 = scalar_lea.vmem %s380_s7, 16  ;;  %s481_s9 = scalar_lea.vmem %s380_s7, 32 }
  0x10   :  { %45 = vperm.xlu0 %470, %v19_v17   ;;  %p478_p0 = scmp.ne.s32.totalorder %s380_s7, %s477_s8  ;;  %p482_p1 = scmp.lt.s32.totalorder %s380_s7, %s380_s7 }
  0x11   :  { %40 = vperm.xlu1 %471, %v18_v19   ;;  %p483_p2 = scmp.lt.s32.totalorder %s481_s9, %s477_s8 }
  0x12   :  { %438 = vmatmul.mubr.msk.f32.gmra.mxu0 %vm78_vm0, %v35_v16 }
  0x13   :  { %440 = vmatprep.mubr.msk.f32.mxu0 %vm78_vm0, %v36_v18  ;;  %p484_p3 = por %p483_p2, %p482_p1 }
  0x14   :  { %472 = vset.pattern.permute.xlu0 %v500_v22 }
  0x15   :  { %473 = vset.pattern.permute.xlu1 %v500_v22  ;;  %221 = vperm.xlu0 %472, %v18_v19   ;;  %p485_p4 = pnand %p484_p3, %p478_p0 }
  0x16   :  { %441 = vmatmul.mubr.msk.f32.gmra.mxu0 %vm78_vm0, %v37_v20  ;;  %225 = vperm.xlu1 %473, %v19_v17  }
  0x19   :  { %233 = vperm.xlu0 %472, %v21_v13  }
  0x1a   :  { %229 = vperm.xlu1 %473, %v20_v15  }
  0x1d   :  { %475 = vset.pattern.permute.xlu0 %v501_v23 }
  0x1e   :  { %474 = vset.pattern.permute.xlu1 %v501_v23  ;;  %343 = vperm.xlu0 %475, %v19_v17  }
  0x1f   :  { %339 = vperm.xlu1 %474, %v18_v19  }
  0x22   :  { %476 = vset.pattern.permute.xlu0 %v502_v24 }
  0x23   :  { %347 = vperm.xlu1 %474, %v20_v15   ;;  %368 = vperm.xlu0 %476, %v18_v19  }
  0x27   :  { %351 = vperm.xlu1 %474, %v21_v13  }
  0x7e   :  { %v76_v26 = vpop.permute.xlu0 %75 }
  0x7f   :  { %v66_v28 = vpop.permute.xlu1 %65 }
  0x83   :  { %v71_v31 = vpop.permute.xlu0 %70 }
  0x84   :  { %v61_v33 = vpop.permute.xlu1 %60 }
  0x87   :  { %v56_v37 = vpop.permute.xlu0 %55 }
  0x88   :  { %v51_v42 = vpop.permute.xlu1 %50 }
  0x8b   :  { %v46_v47 = vpop.permute.xlu0 %45 }
  0x8c   :  { %v41_v50 = vpop.permute.xlu1 %40 }
  0x90   :  { %v222_v62 = vpop.permute.xlu0 %221 }
  0x91   :  { %v226_v60 = vpop.permute.xlu1 %225 }
  0x94   :  { %v234_v0 = vpop.permute.xlu0 %233 }
  0x95   :  { %v230_v61 = vpop.permute.xlu1 %229 }
  0x99   :  { %v344_v10 = vpop.permute.xlu0 %343 }
  0x9a   :  { %v340_v63 = vpop.permute.xlu1 %339 }
  0x9e   :  { %v348_v7 = vpop.permute.xlu1 %347 }
  0xa2   :  { %v352_v19 = vpop.permute.xlu1 %351 }
  0xca   :  { %v433_v25 = vpop.f32.mrf.mxu0 }
  0xcb   :  { %v175_v51 = vadd.f32 %v433_v25, %v46_v47 }
  0xcc   :  { %v169_v27 = vpop.f32.mrf.mxu0 }
  0xcd   :  { %v170_v53 = vadd.f32 %v169_v27, %v41_v50  ;;  %v209_v55 = vmax.f32 %v175_v51, 0.0 }
  0xce   :  { %v436_v29 = vpop.f32.mrf.mxu0 }
  0xcf   :  { %v185_v45 = vadd.f32 %v436_v29, %v56_v37  ;;  %v208_v56 = vmax.f32 %v170_v53, 0.0 }
  0xd0   :  { %v179_v30 = vpop.f32.mrf.mxu0 }
  0xd1   :  { %v180_v48 = vadd.f32 %v179_v30, %v51_v42  ;;  %v211_v52 = vmax.f32 %v185_v45, 0.0 }
  0xd2   :  { %v439_v32 = vpop.f32.mrf.mxu0 }
  0xd3   :  { %v195_v39 = vadd.f32 %v439_v32, %v66_v28  ;;  %v210_v54 = vmax.f32 %v180_v48, 0.0  ;;  %v369_v28 = vpop.permute.xlu0 %368 }
  0xd4   :  { %v189_v34 = vpop.f32.mrf.mxu0 }
  0xd5   :  { %v190_v43 = vadd.f32 %v189_v34, %v61_v33  ;;  %v213_v46 = vmax.f32 %v195_v39, 0.0 }
  0xd6   :  { %v442_v35 = vpop.f32.mrf.mxu0 }
  0xd7   :  { %v205_v36 = vadd.f32 %v442_v35, %v76_v26  ;;  %v212_v49 = vmax.f32 %v190_v43, 0.0 }
  0xd8   :  { %v199_v38 = vpop.f32.mrf.mxu0 }
  0xd9   :  { %v215_v40 = vmax.f32 %v205_v36, 0.0  ;;  %v200_v41 = vadd.f32 %v199_v38, %v71_v31 }
  0xdb   :  { %v214_v44 = vmax.f32 %v200_v41, 0.0  ;;  %443 = vmatprep.subr.mxu1 %v215_v40 }
  0xdc   :  { %444 = vmatpush3.msra.mxu1 %v215_v40 }
  0xdd   :  { %445 = vmatprep.subr.mxu1 %v214_v44 }
  0xde   :  { %446 = vmatpush3.msra.mxu1 %v214_v44 }
  0xdf   :  { %447 = vmatprep.subr.mxu1 %v213_v46 }
  0xe0   :  { %448 = vmatpush3.msra.mxu1 %v213_v46 }
  0xe1   :  { %449 = vmatprep.subr.mxu1 %v212_v49 }
  0xe2   :  { %450 = vmatpush3.msra.mxu1 %v212_v49 }
  0xe3   :  { %451 = vmatprep.subr.mxu1 %v211_v52 }
  0xe4   :  { %452 = vmatpush3.msra.mxu1 %v211_v52 }
  0xe5   :  { %453 = vmatprep.subr.mxu1 %v210_v54 }
  0xe6   :  { %454 = vmatpush3.msra.mxu1 %v210_v54 }
  0xe7   :  { %455 = vmatprep.subr.mxu1 %v209_v55 }
  0xe8   :  { %456 = vmatpush3.msra.mxu1 %v209_v55 }
  0xe9   :  { %457 = vmatprep.subr.mxu1 %v208_v56 }
  0xea   :  { %458 = vmatpush3.msra.mxu1 %v208_v56 }
  0xeb   :  { %460 = vmatmul.mubr.msk.f32.vlgmr.msra.gmra.mxu1 %vm236_vm1, %v217_v57 }
  0xec   :  { %462 = vmatprep.mubr.msk.f32.mxu1 %vm236_vm1, %v218_v58 }
  0xef   :  { %463 = vmatmul.mubr.msk.f32.gmra.mxu1 %vm236_vm1, %v219_v59 }
 0x1ab   :  { %v461_v1 = vpop.f32.mrf.mxu1 }
 0x1ac   :  { %v321_v2 = vadd.f32 %v461_v1, %v226_v60 }
 0x1ad   :  { %v315_v3 = vpop.f32.mrf.mxu1 }
 0x1ae   :  { %v316_v4 = vadd.f32 %v315_v3, %v222_v62  ;;  %v335_v6 = vmax.f32 %v321_v2, 0.0 }
 0x1af   :  { %v464_v5 = vpop.f32.mrf.mxu1 }
 0x1b0   :  { %v334_v8 = vmax.f32 %v316_v4, 0.0  ;;  %v331_v9 = vadd.f32 %v464_v5, %v234_v0  ;;  %v355_v14 = vmul.f32 %v344_v10, %v335_v6 }
 0x1b1   :  { %v325_v11 = vpop.f32.mrf.mxu1 }
 0x1b2   :  { %v354_v12 = vmul.f32 %v340_v63, %v334_v8  ;;  %v326_v13 = vadd.f32 %v325_v11, %v230_v61  ;;  %v337_v15 = vmax.f32 %v331_v9, 0.0 }
 0x1b4   :  { %v336_v16 = vmax.f32 %v326_v13, 0.0  ;;  %v358_v17 = vadd.f32 %v355_v14, %v354_v12  ;;  %v357_v20 = vmul.f32 %v352_v19, %v337_v15 }
 0x1b6   :  { %v356_v18 = vmul.f32 %v348_v7, %v336_v16 }
 0x1b8   :  { %v359_v21 = vadd.f32 %v358_v17, %v356_v18 }
 0x1ba   :  { %v360_v22 = vadd.f32 %v359_v21, %v357_v20 }
 0x1bc   :  { %v361_v23 = vrot.slane %v360_v22, 4 }
 0x1be   :  { %v362_v24 = vadd.f32 %v361_v23, %v360_v22 }
 0x1c0   :  { %v363_v25 = vrot.slane %v362_v24, 2 }
 0x1c2   :  { %v364_v26 = vadd.f32 %v363_v25, %v362_v24 }
 0x1c4   :  { %v365_v27 = vrot.slane %v364_v26, 1 }
 0x1c6   :  { %v366_v29 = vadd.f32 %v365_v27, %v364_v26 }
 0x1c8   :  { %v371_v30 = vadd.f32 %v369_v28, %v366_v29 }
 0x1ca   :  { %372 = vst [vmem:[#allocation2] sm:$0x1] %v371_v30 }
 0x1cb   :  { %488 = shalt.err (!%p485_p4)
}
 0x1cc   :  { %382 = dma.vmem_to_hbm [thread:$0]  %s380_s7, 16, %s620_s4, [#allocation3]  }
 0x1cd   :  { %497 = dma.done.wait [#allocation3], 16  }
 0x1ce   :  { %498 = vsyncadd [#allocation3], 4294967280 }
 0x1cf   :  { %386 = vsyncpa [#allocation3], 1 }

</bundles_post_ra>
